<compile_context>
chip_gen: v7x
topology: tpu7x:2x2x1
jax: 0.10.0
libtpu: 0.0.40
codegen_flags: <defaults>
</compile_context>

<pallas_src>
import functools

import jax
import jax.numpy as jnp
from jax.experimental import pallas as pl
from jax.experimental.pallas import tpu as pltpu


def s2fb2_kernel(x1_ref, x2_ref, wc_ref, bc_ref, mask_ref, w1t_ref, b1_ref,
                 w2_ref, b2_ref, o_ref, patch_ref, *, W):
    """Fused DSC (depthwise+pointwise) + CALayer + residual for one batch elem.

    x1_ref   : (1, C, HW)    residual / first input  (flattened spatial)
    x2_ref   : (1, C, HW)    second input
    wc_ref   : (C, 2C*9)     combined depthwise*pointwise weight (tap-major)
    bc_ref   : (C, 1)        combined conv bias
    mask_ref : (9, HW)       0/1 border-validity mask per 3x3 tap
    w1t_ref  : (C, r)        CA squeeze weight (stored transposed)
    b1_ref   : (1, r)        CA squeeze bias
    w2_ref   : (C, r)        CA excite weight
    b2_ref   : (C, 1)        CA excite bias
    o_ref    : (1, C, HW)    output
    patch_ref: (2C*9, HW)    VMEM scratch: in-kernel im2col buffer
    """
    C = x1_ref.shape[1]
    HW = x1_ref.shape[2]
    C2 = 2 * C

    x1v = x1_ref[0]                                      # (C, HW) f32
    x2v = x2_ref[0]

    # Center tap (dy=0, dx=0): identity, mask all ones.  Write it first so we
    # can re-read the concatenated (2C, HW) slab with a single aligned load.
    center = 4                                           # t = (0+1)*3 + (0+1)
    base_c = center * C2
    patch_ref[pl.ds(base_c, C), :] = x1v
    patch_ref[pl.ds(base_c + C, C), :] = x2v
    xc = patch_ref[pl.ds(base_c, C2), :]                 # (2C, HW)

    # Remaining 8 taps: lane-roll of the flattened image + border mask.
    # shifted[p] = xc[p + dy*W + dx]  (wrapped lanes are zeroed by the mask).
    t = 0
    for dy in (-1, 0, 1):
        for dx in (-1, 0, 1):
            s = dy * W + dx
            if s != 0:
                m = mask_ref[pl.ds(t, 1), :]             # (1, HW) 0/1
                tap = pltpu.roll(xc, (-s) % HW, 1) * m   # (2C, HW)
                patch_ref[pl.ds(t * C2, C2), :] = tap
            t += 1

    # Fused depthwise-3x3 + pointwise-1x1 conv: one MXU matmul, contraction
    # 2C*9, with the im2col patches living entirely in VMEM.
    fea = jnp.dot(wc_ref[...], patch_ref[...],
                  preferred_element_type=jnp.float32)    # (C, HW)
    fea = fea + bc_ref[...]

    # ---- CALayer ----------------------------------------------------------
    gap = jnp.sum(fea, axis=-1, keepdims=True) * (1.0 / HW)           # (C, 1)
    # squeeze 1x1: z1[j] = sum_c W1[j, c] * gap[c]   (W1 stored as (C, r))
    z1 = jnp.sum(w1t_ref[...] * gap, axis=0, keepdims=True) + b1_ref[...]
    z1 = jnp.maximum(z1, 0.0)                                         # (1, r)
    # excite 1x1: z2[c] = sum_j W2[c, j] * z1[j]
    z2 = jnp.sum(w2_ref[...] * z1, axis=-1, keepdims=True) + b2_ref[...]
    scale = 1.0 / (1.0 + jnp.exp(-z2))                                # (C, 1)

    # ---- channel-wise scale + residual ------------------------------------
    o_ref[0] = (fea * scale + x1v).astype(o_ref.dtype)


@jax.jit
def s2fb2_forward(x1, x2, wd, bd, wp, bp, w1, b1, w2, b2):
    """x1, x2: (N, C, H, W);  wd: (2C,1,3,3); bd: (2C,);  wp: (C,2C,1,1);
    bp: (C,);  w1: (r, C); b1: (r,);  w2: (C, r); b2: (C,)."""
    N, C, H, W = x1.shape
    C2 = 2 * C
    K = 3
    HW = H * W
    r = w1.shape[0]

    # Fold depthwise (2C,1,3,3) and pointwise (C,2C,1,1) convs into a single
    # weight matrix, tap-major / channel-minor to match the kernel's patch
    # buffer row ordering:  col = t*2C + c,  t = (dy+1)*3 + (dx+1).
    wp2d = wp.reshape(C, C2)                              # (C, 2C)
    wd2d = wd.reshape(C2, K * K)                          # (2C, 9)
    wcomb = (wp2d[:, None, :] * jnp.transpose(wd2d)[None, :, :]
             ).reshape(C, K * K * C2)                     # (C, 2C*9)
    bcomb = (wp2d @ bd + bp).reshape(C, 1)

    # Precomputed 0/1 border masks for the 9 taps over the flat H*W lane axis.
    hh = jnp.arange(H).reshape(H, 1)
    ww = jnp.arange(W).reshape(1, W)
    mask_rows = []
    for dy in (-1, 0, 1):
        for dx in (-1, 0, 1):
            m = ((hh + dy >= 0) & (hh + dy < H) &
                 (ww + dx >= 0) & (ww + dx < W))
            mask_rows.append(m.reshape(HW))
    masks = jnp.stack(mask_rows, axis=0).astype(jnp.float32)   # (9, HW)

    w1t = jnp.transpose(w1)                               # (C, r)
    b1r = b1.reshape(1, r)
    b2c = b2.reshape(C, 1)

    x1f = x1.reshape(N, C, HW)                            # pure reshapes,
    x2f = x2.reshape(N, C, HW)                            # no HBM shuffles

    kernel = functools.partial(s2fb2_kernel, W=W)

    out = pl.pallas_call(
        kernel,
        out_shape=jax.ShapeDtypeStruct((N, C, HW), x1.dtype),
        grid=(N,),
        in_specs=[
            pl.BlockSpec((1, C, HW), lambda b: (b, 0, 0)),
            pl.BlockSpec((1, C, HW), lambda b: (b, 0, 0)),
            pl.BlockSpec((C, K * K * C2), lambda b: (0, 0)),
            pl.BlockSpec((C, 1), lambda b: (0, 0)),
            pl.BlockSpec((K * K, HW), lambda b: (0, 0)),
            pl.BlockSpec((C, r), lambda b: (0, 0)),
            pl.BlockSpec((1, r), lambda b: (0, 0)),
            pl.BlockSpec((C, r), lambda b: (0, 0)),
            pl.BlockSpec((C, 1), lambda b: (0, 0)),
        ],
        out_specs=pl.BlockSpec((1, C, HW), lambda b: (b, 0, 0)),
        scratch_shapes=[pltpu.VMEM((K * K * C2, HW), jnp.float32)],
        compiler_params=pltpu.CompilerParams(
            dimension_semantics=("parallel",)),
    )(x1f, x2f, wcomb, bcomb, masks, w1t, b1r, w2, b2c)

    return out.reshape(N, C, H, W)                        # pure reshape


def _reference(x1, x2, wd, bd, wp, bp, w1, b1, w2, b2):
    """Plain-JAX reference (lax convs) matching the torch module."""
    C = x1.shape[1]
    xc = jnp.concatenate([x1, x2], axis=1)
    d = jax.lax.conv_general_dilated(
        xc, wd, window_strides=(1, 1), padding=((1, 1), (1, 1)),
        dimension_numbers=("NCHW", "OIHW", "NCHW"),
        feature_group_count=2 * C) + bd.reshape(1, -1, 1, 1)
    fea = jax.lax.conv_general_dilated(
        d, wp, window_strides=(1, 1), padding=((0, 0), (0, 0)),
        dimension_numbers=("NCHW", "OIHW", "NCHW")) + bp.reshape(1, -1, 1, 1)
    gap = jnp.mean(fea, axis=(2, 3), keepdims=True)        # (N, C, 1, 1)
    z1 = jnp.maximum(
        jnp.einsum("rc,bcij->brij", w1, gap) + b1.reshape(1, -1, 1, 1), 0.0)
    y = jax.nn.sigmoid(
        jnp.einsum("cr,brij->bcij", w2, z1) + b2.reshape(1, -1, 1, 1))
    return fea * y + x1


if __name__ == "__main__":
    # Small shapes consistent with S2FB_2(n_feat=4, reduction=2, bias=True, act=None)
    N, n_feat, H, W = 2, 4, 16, 16
    reduction = 2
    C2 = 2 * n_feat
    r = n_feat // reduction

    key = jax.random.PRNGKey(0)
    keys = jax.random.split(key, 10)
    x1 = jax.random.normal(keys[0], (N, n_feat, H, W), jnp.float32)
    x2 = jax.random.normal(keys[1], (N, n_feat, H, W), jnp.float32)
    wd = jax.random.normal(keys[2], (C2, 1, 3, 3), jnp.float32) * 0.1
    bd = jax.random.normal(keys[3], (C2,), jnp.float32) * 0.1
    wp = jax.random.normal(keys[4], (n_feat, C2, 1, 1), jnp.float32) * 0.1
    bp = jax.random.normal(keys[5], (n_feat,), jnp.float32) * 0.1
    w1 = jax.random.normal(keys[6], (r, n_feat), jnp.float32) * 0.1
    b1 = jax.random.normal(keys[7], (r,), jnp.float32) * 0.1
    w2 = jax.random.normal(keys[8], (n_feat, r), jnp.float32) * 0.1
    b2 = jax.random.normal(keys[9], (n_feat,), jnp.float32) * 0.1

    out = s2fb2_forward(x1, x2, wd, bd, wp, bp, w1, b1, w2, b2)
    out = jax.block_until_ready(out)

    ref = _reference(x1, x2, wd, bd, wp, bp, w1, b1, w2, b2)
    assert out.shape == ref.shape and out.dtype == ref.dtype
    err = float(jnp.max(jnp.abs(out - ref)))
    assert err < 1e-4, f"max abs err {err}"

    print("KERNEL_OK")
</pallas_src>

<mosaic_0001>
module attributes {stable_mosaic.version = 11 : i64} {
  func.func @s2fb2_kernel(%arg0: i32, %arg1: memref<1x4x256xf32, #tpu.memory_space<vmem>>, %arg2: memref<1x4x256xf32, #tpu.memory_space<vmem>>, %arg3: memref<4x72xf32, #tpu.memory_space<vmem>>, %arg4: memref<4x1xf32, #tpu.memory_space<vmem>>, %arg5: memref<9x256xf32, #tpu.memory_space<vmem>>, %arg6: memref<4x2xf32, #tpu.memory_space<vmem>>, %arg7: memref<1x2xf32, #tpu.memory_space<vmem>>, %arg8: memref<4x2xf32, #tpu.memory_space<vmem>>, %arg9: memref<4x1xf32, #tpu.memory_space<vmem>>, %arg10: memref<1x4x256xf32, #tpu.memory_space<vmem>>, %arg11: memref<72x256xf32, #tpu.memory_space<vmem>>) attributes {dimension_semantics = [#tpu.dimension_semantics<parallel>], iteration_bounds = array<i64: 2>, scalar_prefetch = 0 : i64, scratch_operands = 1 : i64, tpu.core_type = #tpu.core_type<tc>, window_params = [{transform_indices = @transform_0, window_bounds = array<i64: 1, 4, 256>}, {transform_indices = @transform_1, window_bounds = array<i64: 1, 4, 256>}, {pipeline_mode = #tpu.pipeline_mode<synchronous>, transform_indices = @transform_2, window_bounds = array<i64: 4, 72>}, {pipeline_mode = #tpu.pipeline_mode<synchronous>, transform_indices = @transform_3, window_bounds = array<i64: 4, 1>}, {pipeline_mode = #tpu.pipeline_mode<synchronous>, transform_indices = @transform_4, window_bounds = array<i64: 9, 256>}, {pipeline_mode = #tpu.pipeline_mode<synchronous>, transform_indices = @transform_5, window_bounds = array<i64: 4, 2>}, {pipeline_mode = #tpu.pipeline_mode<synchronous>, transform_indices = @transform_6, window_bounds = array<i64: 1, 2>}, {pipeline_mode = #tpu.pipeline_mode<synchronous>, transform_indices = @transform_7, window_bounds = array<i64: 4, 2>}, {pipeline_mode = #tpu.pipeline_mode<synchronous>, transform_indices = @transform_8, window_bounds = array<i64: 4, 1>}, {transform_indices = @transform_9, window_bounds = array<i64: 1, 4, 256>}]} {
    %c0 = arith.constant 0 : index
    %c0_0 = arith.constant 0 : index
    %c0_1 = arith.constant 0 : index
    %0 = vector.load %arg1[%c0, %c0_0, %c0_1] : memref<1x4x256xf32, #tpu.memory_space<vmem>>, vector<1x4x256xf32>
    %1 = vector.shape_cast %0 : vector<1x4x256xf32> to vector<4x256xf32>
    %c0_2 = arith.constant 0 : index
    %c0_3 = arith.constant 0 : index
    %c0_4 = arith.constant 0 : index
    %2 = vector.load %arg2[%c0_2, %c0_3, %c0_4] : memref<1x4x256xf32, #tpu.memory_space<vmem>>, vector<1x4x256xf32>
    %3 = vector.shape_cast %2 : vector<1x4x256xf32> to vector<4x256xf32>
    %c32 = arith.constant 32 : index
    %c0_5 = arith.constant 0 : index
    %4 = vector.load %arg11[%c32, %c0_5] : memref<72x256xf32, #tpu.memory_space<vmem>>, vector<4x256xf32>
    tpu.vector_store %arg11[%c32, %c0_5], %1 {strides = array<i32>} : memref<72x256xf32, #tpu.memory_space<vmem>>, vector<4x256xf32>,
    %c36 = arith.constant 36 : index
    %c0_6 = arith.constant 0 : index
    %5 = vector.load %arg11[%c36, %c0_6] : memref<72x256xf32, #tpu.memory_space<vmem>>, vector<4x256xf32>
    tpu.vector_store %arg11[%c36, %c0_6], %3 {strides = array<i32>} : memref<72x256xf32, #tpu.memory_space<vmem>>, vector<4x256xf32>,
    %c32_7 = arith.constant 32 : index
    %c0_8 = arith.constant 0 : index
    %6 = vector.load %arg11[%c32_7, %c0_8] : memref<72x256xf32, #tpu.memory_space<vmem>>, vector<8x256xf32>
    %c0_9 = arith.constant 0 : index
    %c0_10 = arith.constant 0 : index
    %7 = vector.load %arg5[%c0_9, %c0_10] : memref<9x256xf32, #tpu.memory_space<vmem>>, vector<1x256xf32>
    %c17_i32 = arith.constant 17 : i32
    %8 = tpu.dynamic_rotate %6 by %c17_i32 dim 1 : vector<8x256xf32>, i32 -> vector<8x256xf32>
    %9 = vector.broadcast %7 : vector<1x256xf32> to vector<8x256xf32>
    %10 = arith.mulf %8, %9 : vector<8x256xf32>
    %c0_11 = arith.constant 0 : index
    %c0_12 = arith.constant 0 : index
    %11 = vector.load %arg11[%c0_11, %c0_12] : memref<72x256xf32, #tpu.memory_space<vmem>>, vector<8x256xf32>
    tpu.vector_store %arg11[%c0_11, %c0_12], %10 {strides = array<i32>} : memref<72x256xf32, #tpu.memory_space<vmem>>, vector<8x256xf32>,
    %c1 = arith.constant 1 : index
    %c0_13 = arith.constant 0 : index
    %12 = vector.load %arg5[%c1, %c0_13] : memref<9x256xf32, #tpu.memory_space<vmem>>, vector<1x256xf32>
    %c16_i32 = arith.constant 16 : i32
    %13 = tpu.dynamic_rotate %6 by %c16_i32 dim 1 : vector<8x256xf32>, i32 -> vector<8x256xf32>
    %14 = vector.broadcast %12 : vector<1x256xf32> to vector<8x256xf32>
    %15 = arith.mulf %13, %14 : vector<8x256xf32>
    %c8 = arith.constant 8 : index
    %c0_14 = arith.constant 0 : index
    %16 = vector.load %arg11[%c8, %c0_14] : memref<72x256xf32, #tpu.memory_space<vmem>>, vector<8x256xf32>
    tpu.vector_store %arg11[%c8, %c0_14], %15 {strides = array<i32>} : memref<72x256xf32, #tpu.memory_space<vmem>>, vector<8x256xf32>,
    %c2 = arith.constant 2 : index
    %c0_15 = arith.constant 0 : index
    %17 = vector.load %arg5[%c2, %c0_15] : memref<9x256xf32, #tpu.memory_space<vmem>>, vector<1x256xf32>
    %c15_i32 = arith.constant 15 : i32
    %18 = tpu.dynamic_rotate %6 by %c15_i32 dim 1 : vector<8x256xf32>, i32 -> vector<8x256xf32>
    %19 = vector.broadcast %17 : vector<1x256xf32> to vector<8x256xf32>
    %20 = arith.mulf %18, %19 : vector<8x256xf32>
    %c16 = arith.constant 16 : index
    %c0_16 = arith.constant 0 : index
    %21 = vector.load %arg11[%c16, %c0_16] : memref<72x256xf32, #tpu.memory_space<vmem>>, vector<8x256xf32>
    tpu.vector_store %arg11[%c16, %c0_16], %20 {strides = array<i32>} : memref<72x256xf32, #tpu.memory_space<vmem>>, vector<8x256xf32>,
    %c3 = arith.constant 3 : index
    %c0_17 = arith.constant 0 : index
    %22 = vector.load %arg5[%c3, %c0_17] : memref<9x256xf32, #tpu.memory_space<vmem>>, vector<1x256xf32>
    %c1_i32 = arith.constant 1 : i32
    %23 = tpu.dynamic_rotate %6 by %c1_i32 dim 1 : vector<8x256xf32>, i32 -> vector<8x256xf32>
    %24 = vector.broadcast %22 : vector<1x256xf32> to vector<8x256xf32>
    %25 = arith.mulf %23, %24 : vector<8x256xf32>
    %c24 = arith.constant 24 : index
    %c0_18 = arith.constant 0 : index
    %26 = vector.load %arg11[%c24, %c0_18] : memref<72x256xf32, #tpu.memory_space<vmem>>, vector<8x256xf32>
    tpu.vector_store %arg11[%c24, %c0_18], %25 {strides = array<i32>} : memref<72x256xf32, #tpu.memory_space<vmem>>, vector<8x256xf32>,
    %c5 = arith.constant 5 : index
    %c0_19 = arith.constant 0 : index
    %27 = vector.load %arg5[%c5, %c0_19] : memref<9x256xf32, #tpu.memory_space<vmem>>, vector<1x256xf32>
    %c255_i32 = arith.constant 255 : i32
    %28 = tpu.dynamic_rotate %6 by %c255_i32 dim 1 : vector<8x256xf32>, i32 -> vector<8x256xf32>
    %29 = vector.broadcast %27 : vector<1x256xf32> to vector<8x256xf32>
    %30 = arith.mulf %28, %29 : vector<8x256xf32>
    %c40 = arith.constant 40 : index
    %c0_20 = arith.constant 0 : index
    %31 = vector.load %arg11[%c40, %c0_20] : memref<72x256xf32, #tpu.memory_space<vmem>>, vector<8x256xf32>
    tpu.vector_store %arg11[%c40, %c0_20], %30 {strides = array<i32>} : memref<72x256xf32, #tpu.memory_space<vmem>>, vector<8x256xf32>,
    %c6 = arith.constant 6 : index
    %c0_21 = arith.constant 0 : index
    %32 = vector.load %arg5[%c6, %c0_21] : memref<9x256xf32, #tpu.memory_space<vmem>>, vector<1x256xf32>
    %c241_i32 = arith.constant 241 : i32
    %33 = tpu.dynamic_rotate %6 by %c241_i32 dim 1 : vector<8x256xf32>, i32 -> vector<8x256xf32>
    %34 = vector.broadcast %32 : vector<1x256xf32> to vector<8x256xf32>
    %35 = arith.mulf %33, %34 : vector<8x256xf32>
    %c48 = arith.constant 48 : index
    %c0_22 = arith.constant 0 : index
    %36 = vector.load %arg11[%c48, %c0_22] : memref<72x256xf32, #tpu.memory_space<vmem>>, vector<8x256xf32>
    tpu.vector_store %arg11[%c48, %c0_22], %35 {strides = array<i32>} : memref<72x256xf32, #tpu.memory_space<vmem>>, vector<8x256xf32>,
    %c7 = arith.constant 7 : index
    %c0_23 = arith.constant 0 : index
    %37 = vector.load %arg5[%c7, %c0_23] : memref<9x256xf32, #tpu.memory_space<vmem>>, vector<1x256xf32>
    %c240_i32 = arith.constant 240 : i32
    %38 = tpu.dynamic_rotate %6 by %c240_i32 dim 1 : vector<8x256xf32>, i32 -> vector<8x256xf32>
    %39 = vector.broadcast %37 : vector<1x256xf32> to vector<8x256xf32>
    %40 = arith.mulf %38, %39 : vector<8x256xf32>
    %c56 = arith.constant 56 : index
    %c0_24 = arith.constant 0 : index
    %41 = vector.load %arg11[%c56, %c0_24] : memref<72x256xf32, #tpu.memory_space<vmem>>, vector<8x256xf32>
    tpu.vector_store %arg11[%c56, %c0_24], %40 {strides = array<i32>} : memref<72x256xf32, #tpu.memory_space<vmem>>, vector<8x256xf32>,
    %c8_25 = arith.constant 8 : index
    %c0_26 = arith.constant 0 : index
    %42 = vector.load %arg5[%c8_25, %c0_26] : memref<9x256xf32, #tpu.memory_space<vmem>>, vector<1x256xf32>
    %c239_i32 = arith.constant 239 : i32
    %43 = tpu.dynamic_rotate %6 by %c239_i32 dim 1 : vector<8x256xf32>, i32 -> vector<8x256xf32>
    %44 = vector.broadcast %42 : vector<1x256xf32> to vector<8x256xf32>
    %45 = arith.mulf %43, %44 : vector<8x256xf32>
    %c64 = arith.constant 64 : index
    %c0_27 = arith.constant 0 : index
    %46 = vector.load %arg11[%c64, %c0_27] : memref<72x256xf32, #tpu.memory_space<vmem>>, vector<8x256xf32>
    tpu.vector_store %arg11[%c64, %c0_27], %45 {strides = array<i32>} : memref<72x256xf32, #tpu.memory_space<vmem>>, vector<8x256xf32>,
    %c0_28 = arith.constant 0 : index
    %c0_29 = arith.constant 0 : index
    %47 = vector.load %arg3[%c0_28, %c0_29] : memref<4x72xf32, #tpu.memory_space<vmem>>, vector<4x72xf32>
    %c0_30 = arith.constant 0 : index
    %c0_31 = arith.constant 0 : index
    %48 = vector.load %arg11[%c0_30, %c0_31] : memref<72x256xf32, #tpu.memory_space<vmem>>, vector<72x256xf32>
    %cst = arith.constant dense<0.000000e+00> : vector<4x256xf32>
    %49 = tpu.matmul %47, %48, %cst {dimension_numbers = #tpu.dot_dimension_numbers<[1], [0], [0], [1], [0, 0, 1, 1], [], []>} : vector<4x72xf32>, vector<72x256xf32>, vector<4x256xf32> -> vector<4x256xf32>
    %c0_32 = arith.constant 0 : index
    %c0_33 = arith.constant 0 : index
    %50 = vector.load %arg4[%c0_32, %c0_33] : memref<4x1xf32, #tpu.memory_space<vmem>>, vector<4x1xf32>
    %51 = vector.broadcast %50 : vector<4x1xf32> to vector<4x256xf32>
    %52 = arith.addf %49, %51 : vector<4x256xf32>
    %cst_34 = arith.constant dense<0.000000e+00> : vector<4xf32>
    %53 = vector.multi_reduction <add>, %52, %cst_34 [1] : vector<4x256xf32> to vector<4xf32>
    %54 = vector.shape_cast %53 : vector<4xf32> to vector<4x1xf32>
    %cst_35 = arith.constant 3.906250e-03 : f32
    %55 = vector.broadcast %cst_35 : f32 to vector<4x1xf32>
    %56 = arith.mulf %54, %55 : vector<4x1xf32>
    %c0_36 = arith.constant 0 : index
    %c0_37 = arith.constant 0 : index
    %57 = vector.load %arg6[%c0_36, %c0_37] : memref<4x2xf32, #tpu.memory_space<vmem>>, vector<4x2xf32>
    %58 = vector.broadcast %56 : vector<4x1xf32> to vector<4x2xf32>
    %59 = arith.mulf %57, %58 : vector<4x2xf32>
    %cst_38 = arith.constant dense<0.000000e+00> : vector<2xf32>
    %60 = vector.multi_reduction <add>, %59, %cst_38 [0] : vector<4x2xf32> to vector<2xf32>
    %61 = vector.shape_cast %60 : vector<2xf32> to vector<1x2xf32>
    %c0_39 = arith.constant 0 : index
    %c0_40 = arith.constant 0 : index
    %62 = vector.load %arg7[%c0_39, %c0_40] : memref<1x2xf32, #tpu.memory_space<vmem>>, vector<1x2xf32>
    %63 = arith.addf %61, %62 : vector<1x2xf32>
    %cst_41 = arith.constant 0.000000e+00 : f32
    %64 = vector.broadcast %cst_41 : f32 to vector<1x2xf32>
    %65 = arith.maximumf %63, %64 : vector<1x2xf32>
    %c0_42 = arith.constant 0 : index
    %c0_43 = arith.constant 0 : index
    %66 = vector.load %arg8[%c0_42, %c0_43] : memref<4x2xf32, #tpu.memory_space<vmem>>, vector<4x2xf32>
    %67 = vector.broadcast %65 : vector<1x2xf32> to vector<4x2xf32>
    %68 = arith.mulf %66, %67 : vector<4x2xf32>
    %cst_44 = arith.constant dense<0.000000e+00> : vector<4xf32>
    %69 = vector.multi_reduction <add>, %68, %cst_44 [1] : vector<4x2xf32> to vector<4xf32>
    %70 = vector.shape_cast %69 : vector<4xf32> to vector<4x1xf32>
    %c0_45 = arith.constant 0 : index
    %c0_46 = arith.constant 0 : index
    %71 = vector.load %arg9[%c0_45, %c0_46] : memref<4x1xf32, #tpu.memory_space<vmem>>, vector<4x1xf32>
    %72 = arith.addf %70, %71 : vector<4x1xf32>
    %cst_47 = arith.constant 0.000000e+00 : f32
    %73 = vector.broadcast %cst_47 : f32 to vector<4x1xf32>
    %74 = arith.subf %73, %72 : vector<4x1xf32>
    %75 = math.exp %74 : vector<4x1xf32>
    %cst_48 = arith.constant 1.000000e+00 : f32
    %76 = vector.broadcast %cst_48 : f32 to vector<4x1xf32>
    %77 = arith.addf %76, %75 : vector<4x1xf32>
    %cst_49 = arith.constant 1.000000e+00 : f32
    %78 = vector.broadcast %cst_49 : f32 to vector<4x1xf32>
    %79 = arith.divf %78, %77 : vector<4x1xf32>
    %80 = vector.broadcast %79 : vector<4x1xf32> to vector<4x256xf32>
    %81 = arith.mulf %52, %80 : vector<4x256xf32>
    %82 = arith.addf %81, %1 : vector<4x256xf32>
    %c0_50 = arith.constant 0 : index
    %c0_51 = arith.constant 0 : index
    %c0_52 = arith.constant 0 : index
    %83 = vector.load %arg10[%c0_50, %c0_51, %c0_52] : memref<1x4x256xf32, #tpu.memory_space<vmem>>, vector<1x4x256xf32>
    %84 = vector.shape_cast %83 : vector<1x4x256xf32> to vector<4x256xf32>
    %85 = vector.shape_cast %82 : vector<4x256xf32> to vector<1x4x256xf32>
    tpu.vector_store %arg10[%c0_50, %c0_51, %c0_52], %85 {strides = array<i32>} : memref<1x4x256xf32, #tpu.memory_space<vmem>>, vector<1x4x256xf32>,
    return
  }
  func.func @transform_0(%arg0: i32) -> (i32, i32, i32) {
    %c0_i32 = arith.constant 0 : i32
    %c0_i32_0 = arith.constant 0 : i32
    %c0_i32_1 = arith.constant 0 : i32
    return %arg0, %c0_i32, %c0_i32_0 : i32, i32, i32
  }
  func.func @transform_1(%arg0: i32) -> (i32, i32, i32) {
    %c0_i32 = arith.constant 0 : i32
    %c0_i32_0 = arith.constant 0 : i32
    %c0_i32_1 = arith.constant 0 : i32
    return %arg0, %c0_i32, %c0_i32_0 : i32, i32, i32
  }
  func.func @transform_2(%arg0: i32) -> (i32, i32) {
    %c0_i32 = arith.constant 0 : i32
    %c0_i32_0 = arith.constant 0 : i32
    %c0_i32_1 = arith.constant 0 : i32
    return %c0_i32, %c0_i32_0 : i32, i32
  }
  func.func @transform_3(%arg0: i32) -> (i32, i32) {
    %c0_i32 = arith.constant 0 : i32
    %c0_i32_0 = arith.constant 0 : i32
    %c0_i32_1 = arith.constant 0 : i32
    return %c0_i32, %c0_i32_0 : i32, i32
  }
  func.func @transform_4(%arg0: i32) -> (i32, i32) {
    %c0_i32 = arith.constant 0 : i32
    %c0_i32_0 = arith.constant 0 : i32
    %c0_i32_1 = arith.constant 0 : i32
    return %c0_i32, %c0_i32_0 : i32, i32
  }
  func.func @transform_5(%arg0: i32) -> (i32, i32) {
    %c0_i32 = arith.constant 0 : i32
    %c0_i32_0 = arith.constant 0 : i32
    %c0_i32_1 = arith.constant 0 : i32
    return %c0_i32, %c0_i32_0 : i32, i32
  }
  func.func @transform_6(%arg0: i32) -> (i32, i32) {
    %c0_i32 = arith.constant 0 : i32
    %c0_i32_0 = arith.constant 0 : i32
    %c0_i32_1 = arith.constant 0 : i32
    return %c0_i32, %c0_i32_0 : i32, i32
  }
  func.func @transform_7(%arg0: i32) -> (i32, i32) {
    %c0_i32 = arith.constant 0 : i32
    %c0_i32_0 = arith.constant 0 : i32
    %c0_i32_1 = arith.constant 0 : i32
    return %c0_i32, %c0_i32_0 : i32, i32
  }
  func.func @transform_8(%arg0: i32) -> (i32, i32) {
    %c0_i32 = arith.constant 0 : i32
    %c0_i32_0 = arith.constant 0 : i32
    %c0_i32_1 = arith.constant 0 : i32
    return %c0_i32, %c0_i32_0 : i32, i32
  }
  func.func @transform_9(%arg0: i32) -> (i32, i32, i32) {
    %c0_i32 = arith.constant 0 : i32
    %c0_i32_0 = arith.constant 0 : i32
    %c0_i32_1 = arith.constant 0 : i32
    return %arg0, %c0_i32, %c0_i32_0 : i32, i32, i32
  }
}

</mosaic_0001>

<bundles_post_ra>
// kernel: s2fb2_forward.1
= control target key start
LH: loop header
LB: loop body
LE: loop exit
PB: predicated region body
PF: predicated region fallthrough
CT: control target
= control target key end

     0   :  { %s912_s30 = smov 0   ;;  %s1046_s0 = inlined_call_operand.vmem [shape: f32[2,4,256], index: 0, kind: input, shape index: {}]   ;;  %s1047_s1 = inlined_call_operand.vmem [shape: f32[2,4,256], index: 1, kind: input, shape index: {}]   ;;  %s1048_s2 = inlined_call_operand.vmem [shape: f32[4,72], index: 2, kind: input, shape index: {}]   ;;  %s1049_s3 = inlined_call_operand.vmem [shape: f32[4,1], index: 3, kind: input, shape index: {}]   ;;  %s1050_s4 = inlined_call_operand.vmem [shape: f32[9,256], index: 4, kind: input, shape index: {}]   ;;  %s1051_s5 = inlined_call_operand.vmem [shape: f32[4,2], index: 5, kind: input, shape index: {}]   ;;  %s1052_s6 = inlined_call_operand.vmem [shape: f32[1,2], index: 6, kind: input, shape index: {}]   ;;  %s1053_s7 = inlined_call_operand.vmem [shape: f32[4,2], index: 7, kind: input, shape index: {}]   ;;  %s1054_s8 = inlined_call_operand.vmem [shape: f32[4,1], index: 8, kind: input, shape index: {}]   ;;  %s1055_s9 = inlined_call_operand.vmem [shape: f32[2,4,256], index: 9, kind: output, shape index: {}]  }
   0x1 LB: > { %s778_s10 = sadd.s32 4294967295, %s850_s30   ;;  %p782_p0 = scmp.ge.s32.totalorder %s850_s30, 1  ;;  %s850_s30 = sphi %s912_s30, %s19_s30  }
   0x2   : > { %p297_p1 = scmp.lt.s32.totalorder %s850_s30, 3 }
   0x4   : > { %p298_p2 = pnand %p782_p0, %p297_p1 }
   0x5   : > { %p338_p3 = scmp.lt.s32.totalorder (!%p298_p2), %s778_s10, 1  ;;  %s852_s18 = smov (!%p298_p2), 16   ;;  %v858_v6 = vmov (!%p298_p2), 0.0   ;;  %v859_v7 = vmov (!%p298_p2), 0   ;;  %v579_v8 = vld [vmem:[%s1049_s3] sm:$0xf] (!%p298_p2)  ;;  %v372_v9 = vlaneseq (!%p298_p2) }
   0x6   : > { %301 = sbr.rel (%p298_p2) target bundleno = 871 (0x367), region = 56  ;;  %s853_s19 = smov (!%p298_p2), 17   ;;  %653 = vmatprep.mubr.f32.mxu0 (!%p298_p2), %v858_v6  ;;  %836 = vset.pattern.permute.xlu0 (!%p298_p2), %v859_v7  ;;  %v789_v14 = vld [vmem:[%s1050_s4 + $0x1] ss:$8 sm:$0x3] (!%p298_p2)  ;;  %vm585_vm8 = vcmask (!%p298_p2), 588800  }
   0x7   : > { %s854_s20 = smov (!%p298_p2), 15   ;;  %s855_s21 = smov (!%p298_p2), 1   ;;  %837 = vset.pattern.permute.xlu1 (!%p298_p2), %v859_v7  ;;  %v379_v10 = vshrl.u32 (!%p298_p2), %v372_v9, 7  ;;  %v961_v11 = vand.u32 (!%p298_p2), 127, %v372_v9  ;;  %vm660_vm9 = vcmask (!%p298_p2), 1043456   ;;  %vm669_vm10 = vcmask (!%p298_p2), 11264  }
   0x8   : > { %s856_s22 = smov (!%p298_p2), 127   ;;  %s857_s23 = smov (!%p298_p2), 113   ;;  %v367_v15 = vld [vmem:[%s1050_s4] ss:$8 sm:$0x3] (!%p298_p2) }
   0x9   : > { %s860_s24 = smov (!%p298_p2), 112   ;;  %s861_s25 = smov (!%p298_p2), 111   ;;  %v963_v12 = vsub.s32 (!%p298_p2), 0, %v379_v10  ;;  %v965_v13 = vsub.s32 (!%p298_p2), 1, %v379_v10  ;;  %vm398_vm0 = vcmp.lt.s32.totalorder (!%p298_p2), %v961_v11, 16  ;;  %vm374_vm1 = vcmp.lt.s32.totalorder (!%p298_p2), %v961_v11, 17 }
   0xa   : > { %v790_v19 = vld [vmem:[%s1050_s4 + $0x2] ss:$8 sm:$0x3] (!%p298_p2)  ;;  %vm422_vm2 = vcmp.lt.s32.totalorder (!%p298_p2), %v961_v11, 15  ;;  %vm446_vm3 = vcmp.lt.s32.totalorder (!%p298_p2), %v961_v11, 1  ;;  %vm470_vm4 = vcmp.lt.s32.totalorder (!%p298_p2), %v961_v11, 127 }
   0xb   : > { %v405_v18 = vrot.slane (!%p298_p2), %v789_v14, %v963_v12  ;;  %v409_v20 = vrot.slane (!%p298_p2), %v789_v14, %v965_v13  ;;  %v381_v21 = vrot.slane (!%p298_p2), %v367_v15, %v963_v12  ;;  %v385_v22 = vrot.slane (!%p298_p2), %v367_v15, %v965_v13  ;;  %v791_v35 = vld [vmem:[%s1050_s4 + $0x3] ss:$8 sm:$0x3] (!%p298_p2)  ;;  %v792_v46 = vld [vmem:[%s1050_s4 + $0x5] ss:$8 sm:$0x3] (!%p298_p2) }
   0xc   : > { %v429_v25 = vrot.slane (!%p298_p2), %v790_v19, %v963_v12  ;;  %v433_v26 = vrot.slane (!%p298_p2), %v790_v19, %v965_v13  ;;  %v453_v44 = vrot.slane (!%p298_p2), %v791_v35, %v963_v12  ;;  %v457_v45 = vrot.slane (!%p298_p2), %v791_v35, %v965_v13  ;;  %v793_v55 = vld [vmem:[%s1050_s4 + $0x6] ss:$8 sm:$0x3] (!%p298_p2)  ;;  %v794_v6 = vld [vmem:[%s1050_s4 + $0x7] ss:$8 sm:$0x3] (!%p298_p2) }
   0xd   : > { %s1057_s10 = smov (!%p338_p3, %s778_s10), 1  ;;  %v477_v53 = vrot.slane %v792_v46, %v963_v12  ;;  %v481_v54 = vrot.slane %v792_v46, %v965_v13  ;;  %vm494_vm5 = vcmp.lt.s32.totalorder %v961_v11, 113  ;;  %vm518_vm6 = vcmp.lt.s32.totalorder %v961_v11, 112 }
   0xe   : > { %s920_s11 = sshll.u32 %s1057_s10, 3  ;;  %v529_v19 = vrot.slane %v794_v6, %v965_v13  ;;  %vm542_vm7 = vcmp.lt.s32.totalorder %v961_v11, 111  ;;  %v560_v11 = vld [vmem:[%s1048_s2] sm:$0xf] }
   0xf   : > { %s342_s14 = scalar_lea.vmem %s1046_s0, %s920_s11  ;;  %s347_s17 = scalar_lea.vmem %s1047_s1, %s920_s11 }
  0x10   : > { %v930_v0 = vld [vmem:[%s342_s14] sm:$0xff] }
  0x11   : > { %v354_v1 = vld [vmem:[%s347_s17] sm:$0xff]  ;;  %358 = vst [vmem:[#allocation2 + $0x40] sm:$0xf] %v930_v0  ;;  %v935_v3 = vcombine.high %v930_v0, %v930_v0 }
  0x12   : > { %v361_v2 = vcombine.low %v354_v1, %v354_v1  ;;  %364 = vst [vmem:[#allocation2 + $0x48] sm:$0xf0] %v354_v1  ;;  %v501_v1 = vrot.slane %v793_v55, %v963_v12 }
  0x13   : > { %359 = vst [vmem:[#allocation2 + $0x48] sm:$0xf] %v935_v3 }
  0x14   : > { %363 = vst [vmem:[#allocation2 + $0x40] sm:$0xf0] %v361_v2  ;;  %v505_v2 = vrot.slane %v793_v55, %v965_v13 }
  0x1a   : > { %v942_v5 = vld [vmem:[#allocation2 + $0x48] sm:$0xff] }
  0x1b   : > { %v938_v4 = vld [vmem:[#allocation2 + $0x40] sm:$0xff] }
  0x1c   : > { %394 = vrot.lane.b32.xlu1 %v938_v4, %s852_s18  ;;  %368 = vrot.lane.b32.xlu0 %v938_v4, %s853_s19 }
  0x20   : > { %396 = vrot.lane.b32.xlu1 %v942_v5, %s852_s18  ;;  %370 = vrot.lane.b32.xlu0 %v942_v5, %s853_s19  ;;  %s352_s18 = scalar_lea.vmem %s1055_s9, %s920_s11 }
  0x24   : > { %420 = vrot.lane.b32.xlu1 %v942_v5, %s854_s20  ;;  %418 = vrot.lane.b32.xlu0 %v938_v4, %s854_s20 }
  0x28   : > { %444 = vrot.lane.b32.xlu1 %v942_v5, %s855_s21  ;;  %442 = vrot.lane.b32.xlu0 %v938_v4, %s855_s21 }
  0x2c   : > { %468 = vrot.lane.b32.xlu1 %v942_v5, %s856_s22  ;;  %466 = vrot.lane.b32.xlu0 %v938_v4, %s856_s22 }
  0x30   : > { %492 = vrot.lane.b32.xlu1 %v942_v5, %s857_s23  ;;  %490 = vrot.lane.b32.xlu0 %v938_v4, %s857_s23 }
  0x34   : > { %516 = vrot.lane.b32.xlu1 %v942_v5, %s860_s24  ;;  %514 = vrot.lane.b32.xlu0 %v938_v4, %s860_s24 }
  0x38   : > { %540 = vrot.lane.b32.xlu1 %v942_v5, %s861_s25  ;;  %538 = vrot.lane.b32.xlu0 %v938_v4, %s861_s25 }
  0x3c   : > { %582 = vperm.xlu0 %836, %v579_v8  }
  0x8e   : > { %v395_v16 = vpop.permute.xlu1 %394  ;;  %v369_v17 = vpop.permute.xlu0 %368 }
  0x92   : > { %v397_v23 = vpop.permute.xlu1 %396  ;;  %v371_v24 = vpop.permute.xlu0 %370 }
  0x93   : > { %v399_v27 = vsel %vm398_vm0, %v395_v16, %v397_v23  ;;  %v400_v28 = vsel %vm398_vm0, %v397_v23, %v395_v16  ;;  %v375_v29 = vsel %vm374_vm1, %v369_v17, %v371_v24  ;;  %v376_v30 = vsel %vm374_vm1, %v371_v24, %v369_v17 }
  0x94   : > { %v412_v31 = vmul.f32 %v405_v18, %v400_v28  ;;  %v413_v32 = vmul.f32 %v409_v20, %v399_v27  ;;  %v388_v33 = vmul.f32 %v381_v21, %v376_v30  ;;  %v389_v34 = vmul.f32 %v385_v22, %v375_v29  ;;  %v795_v20 = vld [vmem:[%s1050_s4 + $0x10] ss:$8 sm:$0x3] }
  0x95   : > { %v525_v18 = vrot.slane %v794_v6, %v963_v12 }
  0x96   : > { %v421_v36 = vpop.permute.xlu1 %420  ;;  %v419_v37 = vpop.permute.xlu0 %418  ;;  %v802_v38 = vpack.c.bf16 %v413_v32, %v389_v34  ;;  %v804_v39 = vpack.c.bf16 %v412_v31, %v388_v33 }
  0x97   : > { %v423_v40 = vsel %vm422_vm2, %v419_v37, %v421_v36  ;;  %v424_v41 = vsel %vm422_vm2, %v421_v36, %v419_v37 }
  0x98   : > { %v436_v42 = vmul.f32 %v429_v25, %v424_v41  ;;  %v437_v43 = vmul.f32 %v433_v26, %v423_v40  ;;  %803 = vmatprep.subr.bf16.mxu0 %v802_v38  ;;  %v549_v25 = vrot.slane %v795_v20, %v963_v12  ;;  %v553_v26 = vrot.slane %v795_v20, %v965_v13 }
  0x99   : > { %805 = vmatpush1.bf16.msra.mxu0 %v804_v39 }
  0x9a   : > { %v445_v47 = vpop.permute.xlu1 %444  ;;  %v443_v48 = vpop.permute.xlu0 %442 }
  0x9b   : > { %v447_v49 = vsel %vm446_vm3, %v443_v48, %v445_v47  ;;  %v448_v50 = vsel %vm446_vm3, %v445_v47, %v443_v48 }
  0x9c   : > { %v460_v51 = vmul.f32 %v453_v44, %v448_v50  ;;  %v461_v52 = vmul.f32 %v457_v45, %v447_v49 }
  0x9e   : > { %v469_v56 = vpop.permute.xlu1 %468  ;;  %v467_v57 = vpop.permute.xlu0 %466  ;;  %v806_v58 = vpack.c.bf16 %v461_v52, %v437_v43  ;;  %v808_v59 = vpack.c.bf16 %v460_v51, %v436_v42  ;;  %v667_v42 = vld [vmem:[%s1051_s5] sm:$0xf] }
  0x9f   : > { %v471_v60 = vsel %vm470_vm4, %v467_v57, %v469_v56  ;;  %v472_v61 = vsel %vm470_vm4, %v469_v56, %v467_v57  ;;  %v677_v52 = vld [vmem:[%s1052_s6] sm:$0x1] }
  0xa0   : > { %v484_v62 = vmul.f32 %v477_v53, %v471_v60  ;;  %v485_v63 = vmul.f32 %v481_v54, %v472_v61  ;;  %807 = vmatprep.subr.bf16.mxu0 %v806_v58  ;;  %v680_v56 = vld [vmem:[%s1053_s7] sm:$0xf] }
  0xa1   : > { %809 = vmatpush1.bf16.msra.mxu0 %v808_v59  ;;  %v689_v60 = vld [vmem:[%s1054_s8] sm:$0xf] }
  0xa2   : > { %v493_v7 = vpop.permute.xlu1 %492  ;;  %v491_v8 = vpop.permute.xlu0 %490  ;;  %v810_v9 = vpack.c.bf16 %v485_v63, %v942_v5  ;;  %v812_v10 = vpack.c.bf16 %v484_v62, %v938_v4 }
  0xa3   : > { %v495_v14 = vsel %vm494_vm5, %v491_v8, %v493_v7  ;;  %v496_v15 = vsel %vm494_vm5, %v493_v7, %v491_v8 }
  0xa4   : > { %v508_v16 = vmul.f32 %v501_v1, %v495_v14  ;;  %v509_v17 = vmul.f32 %v505_v2, %v496_v15  ;;  %811 = vmatprep.subr.bf16.mxu0 %v810_v9 }
  0xa5   : > { %813 = vmatpush1.bf16.msra.mxu0 %v812_v10 }
  0xa6   : > { %v517_v21 = vpop.permute.xlu1 %516  ;;  %v515_v5 = vpop.permute.xlu0 %514 }
  0xa7   : > { %v519_v22 = vsel %vm518_vm6, %v515_v5, %v517_v21  ;;  %v520_v4 = vsel %vm518_vm6, %v517_v21, %v515_v5 }
  0xa8   : > { %v532_v23 = vmul.f32 %v525_v18, %v519_v22  ;;  %v533_v24 = vmul.f32 %v529_v19, %v520_v4 }
  0xaa   : > { %v541_v27 = vpop.permute.xlu1 %540  ;;  %v539_v28 = vpop.permute.xlu0 %538  ;;  %v814_v29 = vpack.c.bf16 %v533_v24, %v509_v17  ;;  %v816_v30 = vpack.c.bf16 %v532_v23, %v508_v16 }
  0xab   : > { %v543_v31 = vsel %vm542_vm7, %v539_v28, %v541_v27  ;;  %v544_v32 = vsel %vm542_vm7, %v541_v27, %v539_v28 }
  0xac   : > { %v556_v33 = vmul.f32 %v549_v25, %v543_v31  ;;  %v557_v34 = vmul.f32 %v553_v26, %v544_v32  ;;  %815 = vmatprep.subr.bf16.mxu0 %v814_v29 }
  0xad   : > { %817 = vmatpush1.bf16.msra.mxu0 %v816_v30 }
  0xae   : > { %605 = vmatprep.subr.mxu0 %v557_v34 }
  0xb1   : > { %606 = vmatpush1.msra.mxu0 %v556_v33 }
  0xb2   : > { %796 = vmatmul.mubr.msk.f32.vlgmr.msra.gmra.mrb[0].mxu0 %vm585_vm8, %v560_v11 }
  0xbb   : > { %v583_v35 = vpop.permute.xlu0 %582 }
 0x185   : > { %v655_v13 = vpop.f32.mrb[0].mxu0 }
 0x186   : > { %v656_v36 = vadd.f32 %v655_v13, %v583_v35  ;;  %v657_v37 = vpop.f32.mrb[1].mxu0 }
 0x187   : > { %v658_v38 = vadd.f32 %v657_v37, %v583_v35 }
 0x188   : > { %v661_v39 = vsel %vm660_vm9, %v656_v36, 0.0 }
 0x189   : > { %v662_v40 = vsel %vm660_vm9, %v658_v38, 0.0 }
 0x18a   : > { %v663_v41 = vadd.f32 %v662_v40, %v661_v39 }
 0x18c   : > { %664 = vadd.xlane.f32.xlu1 %v663_v41 }
 0x219   : > { %v665_v43 = vpop.xlane.xlu1 %664 }
 0x21a   : > { %v666_v44 = vmul.f32 0.00390625, %v665_v43 }
 0x21c   : > { %v668_v45 = vmul.f32 %v667_v42, %v666_v44 }
 0x21e   : > { %v670_v46 = vsel %vm669_vm10, %v668_v45, 0.0 }
 0x21f   : > { %v671_v47 = vrot.slane %v670_v46, 4 }
 0x221   : > { %v672_v48 = vadd.f32 %v671_v47, %v670_v46 }
 0x223   : > { %v673_v49 = vrot.slane %v672_v48, 2 }
 0x225   : > { %v674_v50 = vadd.f32 %v673_v49, %v672_v48 }
 0x227   : > { %v675_v51 = vrot.slane %v674_v50, 1 }
 0x229   : > { %v676_v53 = vadd.f32 %v675_v51, %v674_v50 }
 0x22b   : > { %v678_v54 = vadd.f32 %v677_v52, %v676_v53 }
 0x22d   : > { %v679_v55 = vmax.f32 %v678_v54, 0.0 }
 0x22f   : > { %v684_v57 = vrot.slane %v679_v55, %v963_v12 }
 0x231   : > { %v685_v58 = vmul.f32 %v684_v57, %v680_v56 }
 0x233   : > { %v686_v59 = vsel %vm669_vm10, %v685_v58, 0.0 }
 0x234   : > { %687 = vadd.xlane.f32.xlu0 %v686_v59 }
 0x2c1   : > { %v688_v61 = vpop.xlane.xlu0 %687 }
 0x2c2   : > { %v690_v62 = vadd.f32 %v689_v60, %v688_v61 }
 0x2c4   : > { %v691_v63 = vsub.f32 0.0, %v690_v62 }
 0x2c6   : > { %v692_v1 = vmul.f32 1.442695, %v691_v63 }
 0x2c8   : > { %840 = vpow2.f32 %v692_v1 }
 0x2d2   : > { %v841_v2 = vpop.eup %840 }
 0x2d3   : > { %v694_v6 = vadd.f32 1.0, %v841_v2 }
 0x2d5   : > { %842 = vrcp.f32 %v694_v6 }
 0x2df   : > { %v843_v7 = vpop.eup %842 }
 0x2e0   : > { %699 = vperm.xlu1 %837, %v843_v7  }
 0x35f   : > { %v700_v8 = vpop.permute.xlu1 %699 }
 0x360   : > { %v702_v12 = vmul.f32 %v700_v8, %v656_v36  ;;  %v703_v9 = vmul.f32 %v700_v8, %v658_v38 }
 0x362   : > { %v704_v10 = vadd.f32 %v702_v12, %v930_v0  ;;  %v705_v14 = vadd.f32 %v703_v9, %v935_v3 }
 0x364   : > { %v708_v15 = vcombine.low %v704_v10, %v705_v14 }
 0x366   : > { %710 = vst [vmem:[%s352_s18] sm:$0xff] %v708_v15 }
 0x367 PF: > { %s19_s30 = sadd.s32 1, %s850_s30  }
 0x368   : > { %p16_p4 = scmp.ge.s32.totalorder %s19_s30, 4  }
 0x36a   :  { %18 = sbr.rel (!%p16_p4) target bundleno = 1 (0x1), region = 96 }

</bundles_post_ra>
